<compile_context>
chip_gen: v5e
topology: v5e:2x2
jax: 0.10.0
libtpu: 0.0.40
codegen_flags: <defaults>
</compile_context>

<pallas_src>
import functools

import jax
import jax.numpy as jnp
from jax import lax
from jax.experimental import pallas as pl
from jax.experimental.pallas import tpu as pltpu


def _io_norm_h_kernel(x_ref, u_ref, umean_ref, uinvstd_ref,
                      w1x_ref, w1u_ref, b1_ref, w2_ref, b2_ref,
                      out_ref, *, tanh_dtype):
    # ---- input normalization in f32 (matches reference precision), then cast
    #      activations to bf16 for the MXU (f32 accumulation). ---------------
    u_n = (u_ref[...] - umean_ref[...]) * uinvstd_ref[...]       # (tb, nu) f32
    x_bf = x_ref[...].astype(w1x_ref.dtype)                      # (tb, nx) bf16
    u_bf = u_n.astype(w1u_ref.dtype)                             # (tb, nu) bf16

    # ---- hidden layer, feature-major result (nh, tb): batch stays on the
    #      128-lane axis so every store is lane-dense.  Contract over the
    #      feature axis of the batch-major tiles (LHS @ RHS^T). --------------
    dn = (((1,), (1,)), ((), ()))
    z = lax.dot_general(w1x_ref[...], x_bf, dn,
                        preferred_element_type=jnp.float32)
    z = z + lax.dot_general(w1u_ref[...], u_bf, dn,
                            preferred_element_type=jnp.float32)
    h = jnp.tanh((z + b1_ref[...]).astype(tanh_dtype))           # EUP epilogue

    # ---- output layer + folded de-normalization: (ny, tb), lane-dense. -----
    y = jnp.dot(w2_ref[...], h.astype(w2_ref.dtype),
                preferred_element_type=jnp.float32)
    out_ref[...] = y + b2_ref[...]


def _choose_tb(batch):
    # Per-grid-step overhead (~0.35 us) dominates below ~512-row tiles, and a
    # wide N fills the 256-wide v6e/v7x MXU — so pick big tiles, but keep >=2
    # grid steps so v7x's second TensorCore gets work via the parallel axis.
    for tb in (2048, 1024, 512, 256, 128):
        if batch >= 2 * tb:
            return tb
    return 128


def _default_tanh_dtype():
    # bf16 EUP roughly doubles tanh throughput on v6e/v7x; older chips
    # (v2-v5) have no bf16 VPU/EUP, keep the epilogue in f32 there.
    try:
        kind = jax.devices()[0].device_kind.lower()
    except Exception:  # pragma: no cover - defensive
        kind = ""
    if any(s in kind for s in ("v2", "v3", "v4", "v5")):
        return jnp.float32
    return jnp.bfloat16


def io_normalization_h(x, u, params, *, tb=None, tanh_dtype=None,
                       feature_major_out=False):
    """Fused Pallas forward of IO_normalization_h with an MLP `fun`.

    x: (B, nx) f32, u: (B, nu) f32 -> y: (B, ny) f32
    (or (ny, B) if feature_major_out=True, skipping the layout transpose).
    """
    (umean, ustd, w1x, w1u, b1, w2, b2, ymean, ystd) = params
    batch, nx = x.shape
    nu = u.shape[1]
    nh = w1x.shape[1]
    ny = w2.shape[1]

    if tb is None:
        tb = _choose_tb(batch)
    if tanh_dtype is None:
        tanh_dtype = _default_tanh_dtype()

    # Fold the OUTPUT de-normalization into the last layer (exact algebra;
    # cached at build time in practice).  The INPUT normalization stays
    # in-kernel in f32 for accuracy.
    w2_f = (w2 * ystd).T.astype(jnp.bfloat16)            # (ny, nh)
    b2_f = (b2 * ystd + ymean).T                         # (ny, 1) f32

    w1x_t = w1x.T.astype(jnp.bfloat16)                   # (nh, nx)
    w1u_t = w1u.T.astype(jnp.bfloat16)                   # (nh, nu)
    b1_t = b1.T                                          # (nh, 1) f32
    uinvstd = 1.0 / ustd                                 # (1, nu) f32

    full = lambda i: (0, 0)
    grid = (pl.cdiv(batch, tb),)

    y_t = pl.pallas_call(
        functools.partial(_io_norm_h_kernel, tanh_dtype=tanh_dtype),
        out_shape=jax.ShapeDtypeStruct((ny, batch), jnp.float32),
        grid_spec=pltpu.PrefetchScalarGridSpec(
            num_scalar_prefetch=0,
            grid=grid,
            in_specs=[
                # Batch-tiled activations, batch-major straight from HBM
                # (no wrapper-side concat / transpose / cast passes).
                pl.BlockSpec((tb, nx), lambda i: (i, 0)),
                pl.BlockSpec((tb, nu), lambda i: (i, 0)),
                # Normalization stats + weights: full-extent, VMEM-resident
                # across the whole grid.
                pl.BlockSpec((1, nu), full),
                pl.BlockSpec((1, nu), full),
                pl.BlockSpec((nh, nx), full),
                pl.BlockSpec((nh, nu), full),
                pl.BlockSpec((nh, 1), full),
                pl.BlockSpec((ny, nh), full),
                pl.BlockSpec((ny, 1), full),
            ],
            out_specs=pl.BlockSpec((ny, tb), lambda i: (0, i)),
        ),
        compiler_params=pltpu.CompilerParams(
            dimension_semantics=("parallel",),   # batch tiles are independent
            vmem_limit_bytes=32 << 20,           # tiles are tiny vs. VMEM
        ),
    )(x, u, umean, uinvstd, w1x_t, w1u_t, b1_t, w2_f, b2_f)

    if feature_major_out:
        return y_t              # (ny, batch), lane-dense, no extra HBM pass
    return y_t.T                # module convention: (batch, ny)


def make_params(key, nx, nu, nh, ny):
    ks = jax.random.split(key, 6)
    w1x = jax.random.normal(ks[0], (nx, nh), jnp.float32) * 0.1
    w1u = jax.random.normal(ks[1], (nu, nh), jnp.float32) * 0.1
    b1 = jnp.zeros((1, nh), jnp.float32)
    w2 = jax.random.normal(ks[2], (nh, ny), jnp.float32) * 0.1
    b2 = jnp.zeros((1, ny), jnp.float32)
    # Normalization statistics (the C(...) tensors of the module).
    umean = jax.random.normal(ks[3], (1, nu), jnp.float32)
    ustd = jnp.abs(jax.random.normal(ks[4], (1, nu), jnp.float32)) + 0.5
    ymean = jnp.full((1, ny), 0.25, jnp.float32)
    ystd = jnp.full((1, ny), 2.0, jnp.float32)
    return (umean, ustd, w1x, w1u, b1, w2, b2, ymean, ystd)


def reference(x, u, params):
    """Pure-JAX f32 reference mirroring the PyTorch forward exactly."""
    (umean, ustd, w1x, w1u, b1, w2, b2, ymean, ystd) = params
    u_n = (u - umean) / ustd
    h = jnp.tanh(x @ w1x + u_n @ w1u + b1)
    y_normed = h @ w2 + b2
    return y_normed * ystd + ymean


if __name__ == "__main__":
    # Batch large enough for 2 grid steps of a 512-row tile (v7x: both TCs);
    # feature sizes match a typical deepSI h-map.
    batch, nx, nu, nh, ny = 1024, 32, 8, 32, 8

    key = jax.random.PRNGKey(0)
    kx, ku, kp = jax.random.split(key, 3)
    x = jax.random.normal(kx, (batch, nx), jnp.float32)
    u = jax.random.normal(ku, (batch, nu), jnp.float32)
    params = make_params(kp, nx, nu, nh, ny)

    y = io_normalization_h(x, u, params)
    jax.block_until_ready(y)

    y_ref = reference(x, u, params)
    assert y.shape == (batch, ny)
    # bf16 MXU operands (+ bf16 tanh on v6e/v7x) vs. the f32 reference; the
    # f32 in-kernel u-normalization keeps this comfortably within tolerance.
    max_err = float(jnp.max(jnp.abs(y - y_ref)))
    assert jnp.allclose(y, y_ref, atol=3e-2, rtol=3e-2), max_err

    print("KERNEL_OK")
</pallas_src>

<mosaic_0001>
module attributes {stable_mosaic.version = 11 : i64} {
  func.func @_io_norm_h_kernel(%arg0: i32, %arg1: memref<512x32xf32, #tpu.memory_space<vmem>>, %arg2: memref<512x8xf32, #tpu.memory_space<vmem>>, %arg3: memref<1x8xf32, #tpu.memory_space<vmem>>, %arg4: memref<1x8xf32, #tpu.memory_space<vmem>>, %arg5: memref<32x32xbf16, #tpu.memory_space<vmem>>, %arg6: memref<32x8xbf16, #tpu.memory_space<vmem>>, %arg7: memref<32x1xf32, #tpu.memory_space<vmem>>, %arg8: memref<8x32xbf16, #tpu.memory_space<vmem>>, %arg9: memref<8x1xf32, #tpu.memory_space<vmem>>, %arg10: memref<8x512xf32, #tpu.memory_space<vmem>>) attributes {dimension_semantics = [#tpu.dimension_semantics<parallel>], iteration_bounds = array<i64: 2>, scalar_prefetch = 0 : i64, scratch_operands = 0 : i64, tpu.core_type = #tpu.core_type<tc>, window_params = [{transform_indices = @transform_0, window_bounds = array<i64: 512, 32>}, {transform_indices = @transform_1, window_bounds = array<i64: 512, 8>}, {pipeline_mode = #tpu.pipeline_mode<synchronous>, transform_indices = @transform_2, window_bounds = array<i64: 1, 8>}, {pipeline_mode = #tpu.pipeline_mode<synchronous>, transform_indices = @transform_3, window_bounds = array<i64: 1, 8>}, {pipeline_mode = #tpu.pipeline_mode<synchronous>, transform_indices = @transform_4, window_bounds = array<i64: 32, 32>}, {pipeline_mode = #tpu.pipeline_mode<synchronous>, transform_indices = @transform_5, window_bounds = array<i64: 32, 8>}, {pipeline_mode = #tpu.pipeline_mode<synchronous>, transform_indices = @transform_6, window_bounds = array<i64: 32, 1>}, {pipeline_mode = #tpu.pipeline_mode<synchronous>, transform_indices = @transform_7, window_bounds = array<i64: 8, 32>}, {pipeline_mode = #tpu.pipeline_mode<synchronous>, transform_indices = @transform_8, window_bounds = array<i64: 8, 1>}, {transform_indices = @transform_9, window_bounds = array<i64: 8, 512>}]} {
    %c0 = arith.constant 0 : index
    %c0_0 = arith.constant 0 : index
    %0 = vector.load %arg2[%c0, %c0_0] : memref<512x8xf32, #tpu.memory_space<vmem>>, vector<512x8xf32>
    %c0_1 = arith.constant 0 : index
    %c0_2 = arith.constant 0 : index
    %1 = vector.load %arg3[%c0_1, %c0_2] : memref<1x8xf32, #tpu.memory_space<vmem>>, vector<1x8xf32>
    %2 = vector.broadcast %1 : vector<1x8xf32> to vector<512x8xf32>
    %3 = arith.subf %0, %2 : vector<512x8xf32>
    %c0_3 = arith.constant 0 : index
    %c0_4 = arith.constant 0 : index
    %4 = vector.load %arg4[%c0_3, %c0_4] : memref<1x8xf32, #tpu.memory_space<vmem>>, vector<1x8xf32>
    %5 = vector.broadcast %4 : vector<1x8xf32> to vector<512x8xf32>
    %6 = arith.mulf %3, %5 : vector<512x8xf32>
    %c0_5 = arith.constant 0 : index
    %c0_6 = arith.constant 0 : index
    %7 = vector.load %arg1[%c0_5, %c0_6] : memref<512x32xf32, #tpu.memory_space<vmem>>, vector<512x32xf32>
    %8 = arith.truncf %7 : vector<512x32xf32> to vector<512x32xbf16>
    %9 = arith.truncf %6 : vector<512x8xf32> to vector<512x8xbf16>
    %c0_7 = arith.constant 0 : index
    %c0_8 = arith.constant 0 : index
    %10 = vector.load %arg5[%c0_7, %c0_8] : memref<32x32xbf16, #tpu.memory_space<vmem>>, vector<32x32xbf16>
    %cst = arith.constant dense<0.000000e+00> : vector<32x512xf32>
    %11 = tpu.matmul %10, %8, %cst {dimension_numbers = #tpu.dot_dimension_numbers<[1], [1], [0], [0], [0, 0, 1, 0], [], []>} : vector<32x32xbf16>, vector<512x32xbf16>, vector<32x512xf32> -> vector<32x512xf32>
    %c0_9 = arith.constant 0 : index
    %c0_10 = arith.constant 0 : index
    %12 = vector.load %arg6[%c0_9, %c0_10] : memref<32x8xbf16, #tpu.memory_space<vmem>>, vector<32x8xbf16>
    %cst_11 = arith.constant dense<0.000000e+00> : vector<32x512xf32>
    %13 = tpu.matmul %12, %9, %cst_11 {dimension_numbers = #tpu.dot_dimension_numbers<[1], [1], [0], [0], [0, 0, 1, 0], [], []>} : vector<32x8xbf16>, vector<512x8xbf16>, vector<32x512xf32> -> vector<32x512xf32>
    %14 = arith.addf %11, %13 : vector<32x512xf32>
    %c0_12 = arith.constant 0 : index
    %c0_13 = arith.constant 0 : index
    %15 = vector.load %arg7[%c0_12, %c0_13] : memref<32x1xf32, #tpu.memory_space<vmem>>, vector<32x1xf32>
    %16 = vector.broadcast %15 : vector<32x1xf32> to vector<32x512xf32>
    %17 = arith.addf %14, %16 : vector<32x512xf32>
    %18 = arith.truncf %17 : vector<32x512xf32> to vector<32x512xbf16>
    %19 = math.tanh %18 : vector<32x512xbf16>
    %c0_14 = arith.constant 0 : index
    %c0_15 = arith.constant 0 : index
    %20 = vector.load %arg8[%c0_14, %c0_15] : memref<8x32xbf16, #tpu.memory_space<vmem>>, vector<8x32xbf16>
    %cst_16 = arith.constant dense<0.000000e+00> : vector<8x512xf32>
    %21 = tpu.matmul %20, %19, %cst_16 {dimension_numbers = #tpu.dot_dimension_numbers<[1], [0], [0], [1], [0, 0, 1, 1], [], []>} : vector<8x32xbf16>, vector<32x512xbf16>, vector<8x512xf32> -> vector<8x512xf32>
    %c0_17 = arith.constant 0 : index
    %c0_18 = arith.constant 0 : index
    %22 = vector.load %arg9[%c0_17, %c0_18] : memref<8x1xf32, #tpu.memory_space<vmem>>, vector<8x1xf32>
    %23 = vector.broadcast %22 : vector<8x1xf32> to vector<8x512xf32>
    %24 = arith.addf %21, %23 : vector<8x512xf32>
    %c0_19 = arith.constant 0 : index
    %c0_20 = arith.constant 0 : index
    %25 = vector.load %arg10[%c0_19, %c0_20] : memref<8x512xf32, #tpu.memory_space<vmem>>, vector<8x512xf32>
    tpu.vector_store %arg10[%c0_19, %c0_20], %24 {strides = array<i32>} : memref<8x512xf32, #tpu.memory_space<vmem>>, vector<8x512xf32>,
    return
  }
  func.func @transform_0(%arg0: i32) -> (i32, i32) {
    %c0_i32 = arith.constant 0 : i32
    %c0_i32_0 = arith.constant 0 : i32
    return %arg0, %c0_i32 : i32, i32
  }
  func.func @transform_1(%arg0: i32) -> (i32, i32) {
    %c0_i32 = arith.constant 0 : i32
    %c0_i32_0 = arith.constant 0 : i32
    return %arg0, %c0_i32 : i32, i32
  }
  func.func @transform_2(%arg0: i32) -> (i32, i32) {
    %c0_i32 = arith.constant 0 : i32
    %c0_i32_0 = arith.constant 0 : i32
    %c0_i32_1 = arith.constant 0 : i32
    return %c0_i32, %c0_i32_0 : i32, i32
  }
  func.func @transform_3(%arg0: i32) -> (i32, i32) {
    %c0_i32 = arith.constant 0 : i32
    %c0_i32_0 = arith.constant 0 : i32
    %c0_i32_1 = arith.constant 0 : i32
    return %c0_i32, %c0_i32_0 : i32, i32
  }
  func.func @transform_4(%arg0: i32) -> (i32, i32) {
    %c0_i32 = arith.constant 0 : i32
    %c0_i32_0 = arith.constant 0 : i32
    %c0_i32_1 = arith.constant 0 : i32
    return %c0_i32, %c0_i32_0 : i32, i32
  }
  func.func @transform_5(%arg0: i32) -> (i32, i32) {
    %c0_i32 = arith.constant 0 : i32
    %c0_i32_0 = arith.constant 0 : i32
    %c0_i32_1 = arith.constant 0 : i32
    return %c0_i32, %c0_i32_0 : i32, i32
  }
  func.func @transform_6(%arg0: i32) -> (i32, i32) {
    %c0_i32 = arith.constant 0 : i32
    %c0_i32_0 = arith.constant 0 : i32
    %c0_i32_1 = arith.constant 0 : i32
    return %c0_i32, %c0_i32_0 : i32, i32
  }
  func.func @transform_7(%arg0: i32) -> (i32, i32) {
    %c0_i32 = arith.constant 0 : i32
    %c0_i32_0 = arith.constant 0 : i32
    %c0_i32_1 = arith.constant 0 : i32
    return %c0_i32, %c0_i32_0 : i32, i32
  }
  func.func @transform_8(%arg0: i32) -> (i32, i32) {
    %c0_i32 = arith.constant 0 : i32
    %c0_i32_0 = arith.constant 0 : i32
    %c0_i32_1 = arith.constant 0 : i32
    return %c0_i32, %c0_i32_0 : i32, i32
  }
  func.func @transform_9(%arg0: i32) -> (i32, i32) {
    %c0_i32 = arith.constant 0 : i32
    %c0_i32_0 = arith.constant 0 : i32
    return %c0_i32, %arg0 : i32, i32
  }
}

</mosaic_0001>

<bundles_post_ra>
// kernel: tpu_custom_call.1
= control target key start
LH: loop header
LB: loop body
LE: loop exit
PB: predicated region body
PF: predicated region fallthrough
CT: control target
= control target key end

     0   :  { %14 = vsyncpa [#allocation3], 0  ;;  %s2044_s0 = inlined_call_operand.vmem [shape: f32[1024,32], index: 0, kind: input, shape index: {}]   ;;  %s2045_s1 = inlined_call_operand.vmem [shape: f32[1024,8], index: 1, kind: input, shape index: {}]   ;;  %s2046_s2 = inlined_call_operand.vmem [shape: f32[1,8], index: 2, kind: input, shape index: {}]   ;;  %s2047_s3 = inlined_call_operand.vmem [shape: f32[1,8], index: 3, kind: input, shape index: {}]   ;;  %s2048_s4 = inlined_call_operand.vmem [shape: bf16[32,32], index: 4, kind: input, shape index: {}]   ;;  %s2049_s5 = inlined_call_operand.vmem [shape: bf16[32,8], index: 5, kind: input, shape index: {}]   ;;  %s2050_s6 = inlined_call_operand.vmem [shape: f32[32,1], index: 6, kind: input, shape index: {}]   ;;  %s2051_s7 = inlined_call_operand.vmem [shape: bf16[8,32], index: 7, kind: input, shape index: {}]   ;;  %s2052_s8 = inlined_call_operand.vmem [shape: f32[8,1], index: 8, kind: input, shape index: {}]   ;;  %s2053_s9 = inlined_call_operand.hbm [shape: f32[8,1024], index: 9, kind: output, shape index: {}]  }
   0x1   :  { %16 = vsyncpa [#allocation3 + $0x1], 0  ;;  %s1560_s30 = smov 0   ;;  %s1562_s10 = smov 0  }
   0x2   :  { %s1564_s11 = smov 0   ;;  %s1566_s12 = smov 0  }
   0x3 LB: > { %s1581_s13 = sadd.s32 4294967295, %s1507_s12   ;;  %s1313_s14 = sadd.s32 4294967294, %s1507_s12   ;;  %s1507_s12 = sphi %s1566_s12, %s2059_s12   ;;  %s1503_s11 = sphi %s1564_s11, %s2058_s11   ;;  %s1499_s10 = sphi %s1562_s10, %s2057_s10   ;;  %s1495_s30 = sphi %s1560_s30, %s2056_s30  }
   0x4   : > { %s1585_s15 = sadd.s32 1, %s1507_s12   ;;  %s228_s16 = sadd.s32 1, %s1503_s11 }
   0x5   : > { %s225_s17 = ssub.s32 %s1507_s12, %s1585_s15  ;;  %p238_p0 = scmp.ne.s32.totalorder %s1503_s11, %s1499_s10 }
   0x6   : > { %p226_p1 = scmp.eq.s32.totalorder %s225_s17, 0  ;;  %p239_p2 = scmp.eq.s32.totalorder %s1581_s13, 1 }
   0x7   : > { %p244_p3 = scmp.ne.s32.totalorder %s1499_s10, %s1495_s30  ;;  %p245_p4 = scmp.eq.s32.totalorder %s1313_s14, 1 }
   0x8   : > { %s1596_s18 = scalar_select %p226_p1, %s1503_s11, %s228_s16  }
   0x9   : > { %p1598_p5 = por %p239_p2, %p238_p0  ;;  %p1602_p6 = por %p245_p4, %p244_p3 }
   0xa   : > { %p1316_p7 = scmp.ge.s32.totalorder %s1507_s12, 1  ;;  %p302_p8 = scmp.lt.s32.totalorder %s1507_s12, 3 }
   0xc   : > { %p303_p9 = pnand %p1316_p7, %p302_p8 }
   0xd   : > { %s1318_s21 = sshll.u32 (!%p303_p9), %s1581_s13, 6  ;;  %s340_s29 = sand.u32 (!%p303_p9), 1, %s1499_s10  }
   0xe   : > { %306 = sbr.rel (%p303_p9) target bundleno = 482 (0x1e2), region = 56  ;;  %p344_p10 = scmp.lt.s32.totalorder (!%p303_p9), %s1318_s21, 127 }
   0xf   : > { %s1317_s14 = sshll.u32 (!%p303_p9), %s340_s29, 5  ;;  %s1226_s26 = scalar_lea.sflag (!%p303_p9), [#allocation3], %s340_s29 }
  0x10   : > { %s342_s16 = scalar_lea.vmem (!%p303_p9), [#allocation2], %s1317_s14 }
  0x13   : > { %s2061_s21 = smov (!%p344_p10, %s1318_s21), 127  ;;  %v1614_v0 = vld [vmem:[%s2046_s2] ss:$0 sm:$0xff]  ;;  %vm703_vm0 = vcmask 64512   ;;  %vm892_vm1 = vcmask 261120  }
  0x14   : > { %s1319_s24 = sshll.u32 %s2061_s21, 3  ;;  %v1627_v1 = vld [vmem:[%s2047_s3] ss:$0 sm:$0xff] }
  0x15   : > { %s1622_s27 = scalar_lea.vmem %s2045_s1, %s1319_s24  ;;  %s1843_s17 = scalar_lea.vmem %s2044_s0, %s1319_s24 }
  0x16   : > { %v371_v2 = vld [vmem:[%s1622_s27 + $0x70] sm:$0xff]  ;;  %v372_v3 = vld [vmem:[%s1622_s27 + $0x78] sm:$0xff]  ;;  %v369_v16 = vld [vmem:[%s1622_s27 + $0x60] sm:$0xff]  ;;  %s1239_s24 = sshll.u32 %s342_s16, 4  ;;  %s1240_s24 = int_to_ptr.vmem [resolvable:$true] %s1239_s24 }
  0x17   : > { %v387_v4 = vld [vmem:[%s1622_s27 + $0xf0] sm:$0xff]  ;;  %v439_v5 = vsub.f32 %v371_v2, %v1614_v0  ;;  %v440_v6 = vsub.f32 %v372_v3, %v1614_v0  ;;  %v388_v7 = vld [vmem:[%s1622_s27 + $0xf8] sm:$0xff]  ;;  %v370_v21 = vld [vmem:[%s1622_s27 + $0x68] sm:$0xff]  ;;  %v437_v30 = vsub.f32 %v369_v16, %v1614_v0 }
  0x18   : > { %v455_v8 = vsub.f32 %v387_v4, %v1614_v0  ;;  %v403_v9 = vld [vmem:[%s1622_s27 + $0x170] sm:$0xff]  ;;  %v404_v10 = vld [vmem:[%s1622_s27 + $0x178] sm:$0xff]  ;;  %v456_v11 = vsub.f32 %v388_v7, %v1614_v0  ;;  %v385_v22 = vld [vmem:[%s1622_s27 + $0xe0] sm:$0xff]  ;;  %v438_v31 = vsub.f32 %v370_v21, %v1614_v0 }
  0x19   : > { %v471_v12 = vsub.f32 %v403_v9, %v1614_v0  ;;  %v472_v13 = vsub.f32 %v404_v10, %v1614_v0  ;;  %v419_v14 = vld [vmem:[%s1622_s27 + $0x1f0] sm:$0xff]  ;;  %v420_v15 = vld [vmem:[%s1622_s27 + $0x1f8] sm:$0xff]  ;;  %v507_v17 = vmul.f32 %v1627_v1, %v439_v5  ;;  %v508_v18 = vmul.f32 %v1627_v1, %v440_v6  ;;  %v386_v27 = vld [vmem:[%s1622_s27 + $0xe8] sm:$0xff] }
  0x1a   : > { %v523_v19 = vmul.f32 %v1627_v1, %v455_v8  ;;  %v487_v20 = vsub.f32 %v419_v14, %v1614_v0  ;;  %v524_v23 = vmul.f32 %v1627_v1, %v456_v11  ;;  %v488_v26 = vsub.f32 %v420_v15, %v1614_v0  ;;  %v401_v36 = vld [vmem:[%s1622_s27 + $0x160] sm:$0xff]  ;;  %v402_v41 = vld [vmem:[%s1622_s27 + $0x168] sm:$0xff]  ;;  %v367_v48 = vld [vmem:[%s1622_s27 + $0x50] sm:$0xff] }
  0x1b   : > { %v539_v24 = vmul.f32 %v1627_v1, %v471_v12  ;;  %v540_v25 = vmul.f32 %v1627_v1, %v472_v13  ;;  %v660_v28 = vpack.c.bf16 %v508_v18, %v507_v17  ;;  %v453_v35 = vsub.f32 %v385_v22, %v1614_v0  ;;  %v417_v42 = vld [vmem:[%s1622_s27 + $0x1e0] sm:$0xff]  ;;  %v418_v43 = vld [vmem:[%s1622_s27 + $0x1e8] sm:$0xff]  ;;  %v368_v52 = vld [vmem:[%s1622_s27 + $0x58] sm:$0xff] }
  0x1c   : > { %v555_v29 = vmul.f32 %v1627_v1, %v487_v20  ;;  %v668_v32 = vpack.c.bf16 %v524_v23, %v523_v19  ;;  %v556_v34 = vmul.f32 %v1627_v1, %v488_v26  ;;  %v505_v38 = vmul.f32 %v1627_v1, %v437_v30  ;;  %v383_v57 = vld [vmem:[%s1622_s27 + $0xd0] sm:$0xff]  ;;  %v384_v58 = vld [vmem:[%s1622_s27 + $0xd8] sm:$0xff]  ;;  %v365_v21 = vld [vmem:[%s1622_s27 + $0x40] sm:$0xff] }
  0x1d   : > { %v676_v33 = vpack.c.bf16 %v540_v25, %v539_v24  ;;  %v732_v37 = vsel %vm703_vm0, %v660_v28, 0  ;;  %v506_v39 = vmul.f32 %v1627_v1, %v438_v31  ;;  %v454_v40 = vsub.f32 %v386_v27, %v1614_v0  ;;  %v399_v63 = vld [vmem:[%s1622_s27 + $0x150] sm:$0xff]  ;;  %v400_v6 = vld [vmem:[%s1622_s27 + $0x158] sm:$0xff]  ;;  %v366_v22 = vld [vmem:[%s1622_s27 + $0x48] sm:$0xff] }
  0x1e   : > { %806 = vmatpush.bf16.xpose.msra.mxu0 %v732_v37  ;;  %v756_v44 = vsel %vm703_vm0, %v668_v32, 0  ;;  %v684_v46 = vpack.c.bf16 %v556_v34, %v555_v29  ;;  %v521_v47 = vmul.f32 %v1627_v1, %v453_v35  ;;  %v469_v51 = vsub.f32 %v401_v36, %v1614_v0  ;;  %v415_v7 = vld [vmem:[%s1622_s27 + $0x1d0] sm:$0xff]  ;;  %v416_v16 = vld [vmem:[%s1622_s27 + $0x1d8] sm:$0xff]  ;;  %v381_v27 = vld [vmem:[%s1622_s27 + $0xc0] sm:$0xff] }
  0x1f   : > { %v780_v45 = vsel %vm703_vm0, %v676_v33, 0  ;;  %825 = vmatpush.bf16.xpose.msra.mxu1 %v756_v44  ;;  %v659_v49 = vpack.c.bf16 %v506_v39, %v505_v38  ;;  %v522_v50 = vmul.f32 %v1627_v1, %v454_v40  ;;  %v470_v54 = vsub.f32 %v402_v41, %v1614_v0  ;;  %v382_v31 = vld [vmem:[%s1622_s27 + $0xc8] sm:$0xff]  ;;  %v397_v32 = vld [vmem:[%s1622_s27 + $0x140] sm:$0xff] }
  0x20   : > { %844 = vmatpush.bf16.xpose.msra.mxu2 %v780_v45  ;;  %v804_v53 = vsel %vm703_vm0, %v684_v46, 0  ;;  %v485_v55 = vsub.f32 %v417_v42, %v1614_v0  ;;  %v486_v56 = vsub.f32 %v418_v43, %v1614_v0  ;;  %v537_v61 = vmul.f32 %v1627_v1, %v469_v51  ;;  %v398_v36 = vld [vmem:[%s1622_s27 + $0x148] sm:$0xff]  ;;  %v413_v41 = vld [vmem:[%s1622_s27 + $0x1c0] sm:$0xff] }
  0x21   : > { %863 = vmatpush.bf16.xpose.msra.mxu3 %v804_v53  ;;  %v729_v59 = vsel %vm703_vm0, %v659_v49, 0  ;;  %v667_v60 = vpack.c.bf16 %v522_v50, %v521_v47  ;;  %v435_v62 = vsub.f32 %v367_v48, %v1614_v0  ;;  %v538_v2 = vmul.f32 %v1627_v1, %v470_v54  ;;  %v414_v46 = vld [vmem:[%s1622_s27 + $0x1c8] sm:$0xff]  ;;  %v363_v47 = vld [vmem:[%s1622_s27 + $0x30] sm:$0xff] }
  0x22   : > { %v553_v3 = vmul.f32 %v1627_v1, %v485_v55  ;;  %v554_v4 = vmul.f32 %v1627_v1, %v486_v56  ;;  %v436_v5 = vsub.f32 %v368_v52, %v1614_v0  ;;  %v451_v10 = vsub.f32 %v383_v57, %v1614_v0  ;;  %v364_v52 = vld [vmem:[%s1622_s27 + $0x38] sm:$0xff] }
  0x23   : > { %v753_v8 = vsel %vm703_vm0, %v667_v60, 0  ;;  %v503_v9 = vmul.f32 %v1627_v1, %v435_v62  ;;  %v452_v11 = vsub.f32 %v384_v58, %v1614_v0  ;;  %v675_v12 = vpack.c.bf16 %v538_v2, %v537_v61  ;;  %v379_v60 = vld [vmem:[%s1622_s27 + $0xb0] sm:$0xff]  ;;  %v380_v61 = vld [vmem:[%s1622_s27 + $0xb8] sm:$0xff] }
  0x24   : > { %v683_v13 = vpack.c.bf16 %v554_v4, %v553_v3  ;;  %v504_v14 = vmul.f32 %v1627_v1, %v436_v5  ;;  %v467_v15 = vsub.f32 %v399_v63, %v1614_v0  ;;  %v519_v17 = vmul.f32 %v1627_v1, %v451_v10  ;;  %v395_v3 = vld [vmem:[%s1622_s27 + $0x130] sm:$0xff]  ;;  %v396_v4 = vld [vmem:[%s1622_s27 + $0x138] sm:$0xff] }
  0x25   : > { %v520_v18 = vmul.f32 %v1627_v1, %v452_v11  ;;  %v468_v19 = vsub.f32 %v400_v6, %v1614_v0  ;;  %v483_v20 = vsub.f32 %v415_v7, %v1614_v0  ;;  %v777_v23 = vsel %vm703_vm0, %v675_v12, 0  ;;  %v411_v7 = vld [vmem:[%s1622_s27 + $0x1b0] sm:$0xff]  ;;  %v412_v12 = vld [vmem:[%s1622_s27 + $0x1b8] sm:$0xff] }
  0x26   : > { %807 = vmatpush.bf16.xpose.msra.mxu0 %v729_v59  ;;  %v801_v24 = vsel %vm703_vm0, %v683_v13, 0  ;;  %v658_v25 = vpack.c.bf16 %v504_v14, %v503_v9  ;;  %v535_v26 = vmul.f32 %v1627_v1, %v467_v15  ;;  %v484_v30 = vsub.f32 %v416_v16, %v1614_v0 }
  0x27   : > { %826 = vmatpush.bf16.xpose.msra.mxu1 %v753_v8  ;;  %v666_v28 = vpack.c.bf16 %v520_v18, %v519_v17  ;;  %v536_v29 = vmul.f32 %v1627_v1, %v468_v19  ;;  %v551_v33 = vmul.f32 %v1627_v1, %v483_v20  ;;  %v433_v34 = vsub.f32 %v365_v21, %v1614_v0 }
  0x28   : > { %845 = vmatpush.bf16.xpose.msra.mxu2 %v777_v23  ;;  %v434_v35 = vsub.f32 %v366_v22, %v1614_v0  ;;  %v726_v37 = vsel %vm703_vm0, %v658_v25, 0  ;;  %v552_v39 = vmul.f32 %v1627_v1, %v484_v30  ;;  %v449_v40 = vsub.f32 %v381_v27, %v1614_v0  ;;  %v361_v27 = vld [vmem:[%s1622_s27 + $0x20] sm:$0xff] }
  0x29   : > { %864 = vmatpush.bf16.xpose.msra.mxu3 %v801_v24  ;;  %v674_v38 = vpack.c.bf16 %v536_v29, %v535_v26  ;;  %v750_v42 = vsel %vm703_vm0, %v666_v28, 0  ;;  %v501_v43 = vmul.f32 %v1627_v1, %v433_v34  ;;  %v450_v44 = vsub.f32 %v382_v31, %v1614_v0  ;;  %v362_v28 = vld [vmem:[%s1622_s27 + $0x28] sm:$0xff]  ;;  %v377_v29 = vld [vmem:[%s1622_s27 + $0xa0] sm:$0xff] }
  0x2a   : > { %v465_v45 = vsub.f32 %v397_v32, %v1614_v0  ;;  %v682_v49 = vpack.c.bf16 %v552_v39, %v551_v33  ;;  %v502_v50 = vmul.f32 %v1627_v1, %v434_v35  ;;  %v466_v51 = vsub.f32 %v398_v36, %v1614_v0  ;;  %v378_v31 = vld [vmem:[%s1622_s27 + $0xa8] sm:$0xff]  ;;  %v393_v32 = vld [vmem:[%s1622_s27 + $0x120] sm:$0xff] }
  0x2b   : > { %v774_v48 = vsel %vm703_vm0, %v674_v38, 0  ;;  %v517_v53 = vmul.f32 %v1627_v1, %v449_v40  ;;  %v518_v54 = vmul.f32 %v1627_v1, %v450_v44  ;;  %v481_v56 = vsub.f32 %v413_v41, %v1614_v0  ;;  %v394_v33 = vld [vmem:[%s1622_s27 + $0x128] sm:$0xff]  ;;  %v409_v38 = vld [vmem:[%s1622_s27 + $0x1a0] sm:$0xff] }
  0x2c   : > { %v533_v55 = vmul.f32 %v1627_v1, %v465_v45  ;;  %v534_v57 = vmul.f32 %v1627_v1, %v466_v51  ;;  %v482_v58 = vsub.f32 %v414_v46, %v1614_v0  ;;  %v431_v59 = vsub.f32 %v363_v47, %v1614_v0  ;;  %v410_v39 = vld [vmem:[%s1622_s27 + $0x1a8] sm:$0xff]  ;;  %v359_v51 = vld [vmem:[%s1622_s27 + $0x10] sm:$0xff] }
  0x2d   : > { %v798_v62 = vsel %vm703_vm0, %v682_v49, 0  ;;  %v549_v63 = vmul.f32 %v1627_v1, %v481_v56  ;;  %v432_v2 = vsub.f32 %v364_v52, %v1614_v0  ;;  %v657_v5 = vpack.c.bf16 %v502_v50, %v501_v43  ;;  %v360_v52 = vld [vmem:[%s1622_s27 + $0x18] sm:$0xff] }
  0x2e   : > { %808 = vmatpush.bf16.xpose.msra.mxu0 %v726_v37  ;;  %v550_v6 = vmul.f32 %v1627_v1, %v482_v58  ;;  %v665_v8 = vpack.c.bf16 %v518_v54, %v517_v53  ;;  %v673_v9 = vpack.c.bf16 %v534_v57, %v533_v55  ;;  %v447_v10 = vsub.f32 %v379_v60, %v1614_v0  ;;  %v375_v57 = vld [vmem:[%s1622_s27 + $0x90] sm:$0xff]  ;;  %v376_v58 = vld [vmem:[%s1622_s27 + $0x98] sm:$0xff] }
  0x2f   : > { %827 = vmatpush.bf16.xpose.msra.mxu1 %v750_v42  ;;  %v448_v11 = vsub.f32 %v380_v61, %v1614_v0  ;;  %v499_v13 = vmul.f32 %v1627_v1, %v431_v59  ;;  %v500_v14 = vmul.f32 %v1627_v1, %v432_v2  ;;  %v463_v15 = vsub.f32 %v395_v3, %v1614_v0  ;;  %v392_v2 = vld [vmem:[%s1622_s27 + $0x118] sm:$0xff] }
  0x30   : > { %846 = vmatpush.bf16.xpose.msra.mxu2 %v774_v48  ;;  %v464_v16 = vsub.f32 %v396_v4, %v1614_v0  ;;  %v681_v17 = vpack.c.bf16 %v550_v6, %v549_v63  ;;  %v515_v18 = vmul.f32 %v1627_v1, %v447_v10  ;;  %v479_v20 = vsub.f32 %v411_v7, %v1614_v0  ;;  %v391_v63 = vld [vmem:[%s1622_s27 + $0x110] sm:$0xff] }
  0x31   : > { %865 = vmatpush.bf16.xpose.msra.mxu3 %v798_v62  ;;  %v516_v19 = vmul.f32 %v1627_v1, %v448_v11  ;;  %v723_v21 = vsel %vm703_vm0, %v657_v5, 0  ;;  %v531_v22 = vmul.f32 %v1627_v1, %v463_v15  ;;  %v480_v24 = vsub.f32 %v412_v12, %v1614_v0 }
  0x32   : > { %v532_v23 = vmul.f32 %v1627_v1, %v464_v16  ;;  %v747_v25 = vsel %vm703_vm0, %v665_v8, 0  ;;  %v771_v26 = vsel %vm703_vm0, %v673_v9, 0  ;;  %v656_v30 = vpack.c.bf16 %v500_v14, %v499_v13  ;;  %v407_v13 = vld [vmem:[%s1622_s27 + $0x190] sm:$0xff]  ;;  %v408_v14 = vld [vmem:[%s1622_s27 + $0x198] sm:$0xff] }
  0x33   : > { %v795_v34 = vsel %vm703_vm0, %v681_v17, 0  ;;  %v664_v35 = vpack.c.bf16 %v516_v19, %v515_v18  ;;  %v547_v36 = vmul.f32 %v1627_v1, %v479_v20  ;;  %v548_v37 = vmul.f32 %v1627_v1, %v480_v24 }
  0x34   : > { %v672_v40 = vpack.c.bf16 %v532_v23, %v531_v22  ;;  %v429_v41 = vsub.f32 %v361_v27, %v1614_v0  ;;  %v430_v42 = vsub.f32 %v362_v28, %v1614_v0  ;;  %v445_v43 = vsub.f32 %v377_v29, %v1614_v0  ;;  %v357_v29 = vld [vmem:[%s1622_s27] sm:$0xff] }
  0x35   : > { %v446_v44 = vsub.f32 %v378_v31, %v1614_v0  ;;  %v461_v45 = vsub.f32 %v393_v32, %v1614_v0  ;;  %v462_v46 = vsub.f32 %v394_v33, %v1614_v0  ;;  %v477_v47 = vsub.f32 %v409_v38, %v1614_v0  ;;  %v373_v31 = vld [vmem:[%s1622_s27 + $0x80] sm:$0xff]  ;;  %v374_v33 = vld [vmem:[%s1622_s27 + $0x88] sm:$0xff] }
  0x36   : > { %809 = vmatpush.bf16.xpose.msra.mxu0 %v723_v21  ;;  %v478_v48 = vsub.f32 %v410_v39, %v1614_v0  ;;  %v720_v49 = vsel %vm703_vm0, %v656_v30, 0  ;;  %v680_v50 = vpack.c.bf16 %v548_v37, %v547_v36  ;;  %v744_v53 = vsel %vm703_vm0, %v664_v35, 0  ;;  %v358_v30 = vld [vmem:[%s1622_s27 + $0x8] sm:$0xff] }
  0x37   : > { %828 = vmatpush.bf16.xpose.msra.mxu1 %v747_v25  ;;  %v768_v54 = vsel %vm703_vm0, %v672_v40, 0  ;;  %v497_v55 = vmul.f32 %v1627_v1, %v429_v41  ;;  %v498_v56 = vmul.f32 %v1627_v1, %v430_v42  ;;  %v513_v59 = vmul.f32 %v1627_v1, %v445_v43  ;;  %v390_v35 = vld [vmem:[%s1622_s27 + $0x108] sm:$0xff]  ;;  %v405_v43 = vld [vmem:[%s1622_s27 + $0x180] sm:$0xff] }
  0x38   : > { %847 = vmatpush.bf16.xpose.msra.mxu2 %v771_v26  ;;  %v514_v60 = vmul.f32 %v1627_v1, %v446_v44  ;;  %v529_v61 = vmul.f32 %v1627_v1, %v461_v45  ;;  %v530_v62 = vmul.f32 %v1627_v1, %v462_v46  ;;  %v545_v3 = vmul.f32 %v1627_v1, %v477_v47  ;;  %v406_v44 = vld [vmem:[%s1622_s27 + $0x188] sm:$0xff] }
  0x39   : > { %866 = vmatpush.bf16.xpose.msra.mxu3 %v795_v34  ;;  %v546_v4 = vmul.f32 %v1627_v1, %v478_v48  ;;  %v427_v5 = vsub.f32 %v359_v51, %v1614_v0  ;;  %v428_v6 = vsub.f32 %v360_v52, %v1614_v0  ;;  %v792_v7 = vsel %vm703_vm0, %v680_v50, 0  ;;  %v389_v34 = vld [vmem:[%s1622_s27 + $0x100] sm:$0xff] }
  0x3a   : > { %v443_v8 = vsub.f32 %v375_v57, %v1614_v0  ;;  %v444_v9 = vsub.f32 %v376_v58, %v1614_v0  ;;  %v655_v10 = vpack.c.bf16 %v498_v56, %v497_v55  ;;  %v459_v11 = vsub.f32 %v391_v63, %v1614_v0 }
  0x3b   : > { %v460_v12 = vsub.f32 %v392_v2, %v1614_v0  ;;  %v663_v15 = vpack.c.bf16 %v514_v60, %v513_v59  ;;  %v671_v16 = vpack.c.bf16 %v530_v62, %v529_v61  ;;  %v679_v17 = vpack.c.bf16 %v546_v4, %v545_v3  ;;  %v571_v60 = vld [vmem:[%s1843_s17 + $0x70] sm:$0xff]  ;;  %v572_v2 = vld [vmem:[%s1843_s17 + $0x78] sm:$0xff] }
  0x3c   : > { %v495_v18 = vmul.f32 %v1627_v1, %v427_v5  ;;  %v496_v19 = vmul.f32 %v1627_v1, %v428_v6  ;;  %v511_v20 = vmul.f32 %v1627_v1, %v443_v8  ;;  %v512_v21 = vmul.f32 %v1627_v1, %v444_v9  ;;  %v587_v3 = vld [vmem:[%s1843_s17 + $0xf0] sm:$0xff]  ;;  %v588_v4 = vld [vmem:[%s1843_s17 + $0xf8] sm:$0xff] }
  0x3d   : > { %v475_v22 = vsub.f32 %v407_v13, %v1614_v0  ;;  %v476_v23 = vsub.f32 %v408_v14, %v1614_v0  ;;  %v717_v24 = vsel %vm703_vm0, %v655_v10, 0  ;;  %v527_v25 = vmul.f32 %v1627_v1, %v459_v11  ;;  %v603_v6 = vld [vmem:[%s1843_s17 + $0x170] sm:$0xff]  ;;  %v620_v11 = vld [vmem:[%s1843_s17 + $0x1f8] sm:$0xff] }
  0x3e   : > { %810 = vmatpush.bf16.xpose.msra.mxu0 %v720_v49  ;;  %v528_v26 = vmul.f32 %v1627_v1, %v460_v12  ;;  %v741_v27 = vsel %vm703_vm0, %v663_v15, 0  ;;  %v765_v28 = vsel %vm703_vm0, %v671_v16, 0  ;;  %v654_v32 = vpack.c.bf16 %v496_v19, %v495_v18  ;;  %v619_v10 = vld [vmem:[%s1843_s17 + $0x1f0] sm:$0xff] }
  0x3f   : > { %829 = vmatpush.bf16.xpose.msra.mxu1 %v744_v53  ;;  %v789_v36 = vsel %vm703_vm0, %v679_v17, 0  ;;  %v662_v37 = vpack.c.bf16 %v512_v21, %v511_v20  ;;  %v543_v38 = vmul.f32 %v1627_v1, %v475_v22  ;;  %v544_v39 = vmul.f32 %v1627_v1, %v476_v23  ;;  %v569_v21 = vld [vmem:[%s1843_s17 + $0x60] sm:$0xff] }
  0x40   : > { %848 = vmatpush.bf16.xpose.msra.mxu2 %v768_v54  ;;  %v670_v40 = vpack.c.bf16 %v528_v26, %v527_v25  ;;  %v425_v41 = vsub.f32 %v357_v29, %v1614_v0  ;;  %v426_v42 = vsub.f32 %v358_v30, %v1614_v0  ;;  %v441_v45 = vsub.f32 %v373_v31, %v1614_v0  ;;  %v585_v25 = vld [vmem:[%s1843_s17 + $0xe0] sm:$0xff]  ;;  %v586_v26 = vld [vmem:[%s1843_s17 + $0xe8] sm:$0xff] }
  0x41   : > { %867 = vmatpush.bf16.xpose.msra.mxu3 %v792_v7  ;;  %v442_v46 = vsub.f32 %v374_v33, %v1614_v0  ;;  %v457_v47 = vsub.f32 %v389_v34, %v1614_v0  ;;  %v458_v48 = vsub.f32 %v390_v35, %v1614_v0  ;;  %v714_v49 = vsel %vm703_vm0, %v654_v32, 0  ;;  %v604_v7 = vld [vmem:[%s1843_s17 + $0x178] sm:$0xff]  ;;  %v602_v29 = vld [vmem:[%s1843_s17 + $0x168] sm:$0xff]  ;;  %v617_v30 = vld [vmem:[%s1843_s17 + $0x1e0] sm:$0xff] }
  0x42   : > { %v678_v50 = vpack.c.bf16 %v544_v39, %v543_v38  ;;  %v473_v51 = vsub.f32 %v405_v43, %v1614_v0  ;;  %v474_v52 = vsub.f32 %v406_v44, %v1614_v0  ;;  %v738_v53 = vsel %vm703_vm0, %v662_v37, 0  ;;  %v618_v31 = vld [vmem:[%s1843_s17 + $0x1e8] sm:$0xff]  ;;  %v1365_v35 = vld [vmem:[%s2049_s5] sm:$0xff]  ;;  %v567_v39 = vld [vmem:[%s1843_s17 + $0x50] sm:$0xff] }
  0x43   : > { %v762_v54 = vsel %vm703_vm0, %v670_v40, 0  ;;  %v493_v55 = vmul.f32 %v1627_v1, %v425_v41  ;;  %v494_v56 = vmul.f32 %v1627_v1, %v426_v42  ;;  %v509_v0 = vmul.f32 %v1627_v1, %v441_v45  ;;  %v568_v41 = vld [vmem:[%s1843_s17 + $0x58] sm:$0xff]  ;;  %v583_v42 = vld [vmem:[%s1843_s17 + $0xd0] sm:$0xff] }
  0x44   : > { %v510_v57 = vmul.f32 %v1627_v1, %v442_v46  ;;  %v525_v58 = vmul.f32 %v1627_v1, %v457_v47  ;;  %v526_v59 = vmul.f32 %v1627_v1, %v458_v48  ;;  %v786_v61 = vsel %vm703_vm0, %v678_v50, 0  ;;  %v584_v43 = vld [vmem:[%s1843_s17 + $0xd8] sm:$0xff]  ;;  %v599_v45 = vld [vmem:[%s1843_s17 + $0x150] sm:$0xff] }
  0x45   : > { %v541_v62 = vmul.f32 %v1627_v1, %v473_v51  ;;  %v542_v63 = vmul.f32 %v1627_v1, %v474_v52  ;;  %v653_v5 = vpack.c.bf16 %v494_v56, %v493_v55  ;;  %v628_v12 = vpack.c.bf16 %v572_v2, %v571_v60  ;;  %v600_v46 = vld [vmem:[%s1843_s17 + $0x158] sm:$0xff]  ;;  %v615_v47 = vld [vmem:[%s1843_s17 + $0x1d0] sm:$0xff]  ;;  %v565_v55 = vld [vmem:[%s1843_s17 + $0x40] sm:$0xff] }
  0x46   : > { %811 = vmatpush.bf16.xpose.msra.mxu0 %v717_v24  ;;  %v661_v8 = vpack.c.bf16 %v510_v57, %v509_v0  ;;  %v669_v9 = vpack.c.bf16 %v526_v59, %v525_v58  ;;  %v636_v13 = vpack.c.bf16 %v588_v4, %v587_v3  ;;  %v644_v14 = vpack.c.bf16 %v604_v7, %v603_v6  ;;  %v570_v24 = vld [vmem:[%s1843_s17 + $0x68] sm:$0xff]  ;;  %v616_v48 = vld [vmem:[%s1843_s17 + $0x1d8] sm:$0xff]  ;;  %v581_v57 = vld [vmem:[%s1843_s17 + $0xc0] sm:$0xff] }
  0x47   : > { %830 = vmatpush.bf16.xpose.msra.mxu1 %v741_v27  ;;  %v677_v1 = vpack.c.bf16 %v542_v63, %v541_v62  ;;  %v711_v15 = vsel %vm703_vm0, %v653_v5, 0  ;;  %v652_v16 = vpack.c.bf16 %v620_v11, %v619_v10  ;;  %v921_v19 = vsel %vm892_vm1, %v628_v12, 0  ;;  %v566_v0 = vld [vmem:[%s1843_s17 + $0x48] sm:$0xff]  ;;  %v597_v60 = vld [vmem:[%s1843_s17 + $0x140] sm:$0xff]  ;;  %v564_v11 = vld [vmem:[%s1843_s17 + $0x38] sm:$0xff] }
  0x48   : > { %849 = vmatpush.bf16.xpose.msra.mxu2 %v765_v28  ;;  %v735_v17 = vsel %vm703_vm0, %v661_v8, 0  ;;  %v759_v18 = vsel %vm703_vm0, %v669_v9, 0  ;;  %v945_v20 = vsel %vm892_vm1, %v636_v13, 0  ;;  %v969_v23 = vsel %vm892_vm1, %v644_v14, 0  ;;  %v601_v28 = vld [vmem:[%s1843_s17 + $0x160] sm:$0xff]  ;;  %v582_v58 = vld [vmem:[%s1843_s17 + $0xc8] sm:$0xff] }
  0x49   : > { %868 = vmatpush.bf16.xpose.msra.mxu3 %v789_v36  ;;  %v783_v22 = vsel %vm703_vm0, %v677_v1, 0  ;;  %v993_v27 = vsel %vm892_vm1, %v652_v16, 0  ;;  %v627_v32 = vpack.c.bf16 %v570_v24, %v569_v21  ;;  %v635_v33 = vpack.c.bf16 %v586_v26, %v585_v25  ;;  %v613_v62 = vld [vmem:[%s1843_s17 + $0x1c0] sm:$0xff]  ;;  %v614_v63 = vld [vmem:[%s1843_s17 + $0x1c8] sm:$0xff]  ;;  %v563_v9 = vld [vmem:[%s1843_s17 + $0x30] sm:$0xff] }
  0x4a   : > { %v643_v34 = vpack.c.bf16 %v602_v29, %v601_v28  ;;  %v651_v36 = vpack.c.bf16 %v618_v31, %v617_v30  ;;  %v634_v50 = vpack.c.bf16 %v584_v43, %v583_v42  ;;  %v642_v51 = vpack.c.bf16 %v600_v46, %v599_v45  ;;  %v1366_v5 = vld [vmem:[%s2049_s5 + $0x8] sm:$0xff]  ;;  %v579_v12 = vld [vmem:[%s1843_s17 + $0xb0] sm:$0xff]  ;;  %v580_v13 = vld [vmem:[%s1843_s17 + $0xb8] sm:$0xff] }
  0x4b   : > { %v918_v37 = vsel %vm892_vm1, %v627_v32, 0  ;;  %v942_v38 = vsel %vm892_vm1, %v635_v33, 0  ;;  %v650_v52 = vpack.c.bf16 %v616_v48, %v615_v47  ;;  %v625_v2 = vpack.c.bf16 %v566_v0, %v565_v55  ;;  %v595_v14 = vld [vmem:[%s1843_s17 + $0x130] sm:$0xff]  ;;  %v561_v24 = vld [vmem:[%s1843_s17 + $0x20] sm:$0xff]  ;;  %v562_v26 = vld [vmem:[%s1843_s17 + $0x28] sm:$0xff] }
  0x4c   : > { %v966_v40 = vsel %vm892_vm1, %v643_v34, 0  ;;  %v990_v44 = vsel %vm892_vm1, %v651_v36, 0  ;;  %v963_v56 = vsel %vm892_vm1, %v642_v51, 0  ;;  %v633_v3 = vpack.c.bf16 %v582_v58, %v581_v57  ;;  %v611_v16 = vld [vmem:[%s1843_s17 + $0x1b0] sm:$0xff]  ;;  %v578_v28 = vld [vmem:[%s1843_s17 + $0xa8] sm:$0xff]  ;;  %v593_v30 = vld [vmem:[%s1843_s17 + $0x120] sm:$0xff] }
  0x4d   : > { %v987_v59 = vsel %vm892_vm1, %v650_v52, 0  ;;  %v649_v6 = vpack.c.bf16 %v614_v63, %v613_v62  ;;  %v912_v7 = vsel %vm892_vm1, %v625_v2, 0  ;;  %v594_v31 = vld [vmem:[%s1843_s17 + $0x128] sm:$0xff]  ;;  %v609_v32 = vld [vmem:[%s1843_s17 + $0x1a0] sm:$0xff]  ;;  %v623_v34 = vpack.c.bf16 %v562_v26, %v561_v24  ;;  %v559_v42 = vld [vmem:[%s1843_s17 + $0x10] sm:$0xff] }
  0x4e   : > { %812 = vmatpush.bf16.xpose.msra.mxu0 %v714_v49  ;;  %v626_v49 = vpack.c.bf16 %v568_v41, %v567_v39  ;;  %v936_v8 = vsel %vm892_vm1, %v633_v3, 0  ;;  %v610_v33 = vld [vmem:[%s1843_s17 + $0x1a8] sm:$0xff]  ;;  %v1071_v36 = vld [vmem:[%s2050_s6] sm:$0xff]  ;;  %v575_v45 = vld [vmem:[%s1843_s17 + $0x90] sm:$0xff] }
  0x4f   : > { %831 = vmatpush.bf16.xpose.msra.mxu1 %v738_v53  ;;  %v984_v1 = vsel %vm892_vm1, %v649_v6, 0  ;;  %v647_v39 = vpack.c.bf16 %v610_v33, %v609_v32  ;;  %v576_v46 = vld [vmem:[%s1843_s17 + $0x98] sm:$0xff]  ;;  %v591_v48 = vld [vmem:[%s1843_s17 + $0x110] sm:$0xff]  ;;  %v557_v57 = vld [vmem:[%s1843_s17] sm:$0xff] }
  0x50   : > { %850 = vmatpush.bf16.xpose.msra.mxu2 %v762_v54  ;;  %v915_v53 = vsel %vm892_vm1, %v626_v49, 0  ;;  %v939_v54 = vsel %vm892_vm1, %v634_v50, 0  ;;  %v592_v49 = vld [vmem:[%s1843_s17 + $0x118] sm:$0xff]  ;;  %v607_v50 = vld [vmem:[%s1843_s17 + $0x190] sm:$0xff]  ;;  %v589_v63 = vld [vmem:[%s1843_s17 + $0x100] sm:$0xff] }
  0x51   : > { %869 = vmatpush.bf16.xpose.msra.mxu3 %v786_v61  ;;  %v598_v61 = vld [vmem:[%s1843_s17 + $0x148] sm:$0xff]  ;;  %v978_v47 = vsel %vm892_vm1, %v647_v39, 0  ;;  %v608_v51 = vld [vmem:[%s1843_s17 + $0x198] sm:$0xff]  ;;  %v605_v3 = vld [vmem:[%s1843_s17 + $0x180] sm:$0xff] }
  0x52   : > { %v641_v4 = vpack.c.bf16 %v598_v61, %v597_v60  ;;  %v646_v55 = vpack.c.bf16 %v608_v51, %v607_v50  ;;  %v573_v60 = vld [vmem:[%s1843_s17 + $0x80] sm:$0xff]  ;;  %v574_v61 = vld [vmem:[%s1843_s17 + $0x88] sm:$0xff] }
  0x53   : > { %v590_v2 = vld [vmem:[%s1843_s17 + $0x108] sm:$0xff]  ;;  %v629_v6 = vpack.c.bf16 %v574_v61, %v573_v60 }
  0x54   : > { %v960_v10 = vsel %vm892_vm1, %v641_v4, 0  ;;  %v975_v62 = vsel %vm892_vm1, %v646_v55, 0  ;;  %v606_v4 = vld [vmem:[%s1843_s17 + $0x188] sm:$0xff] }
  0x56   : > { %813 = vmatpush.bf16.xpose.msra.mxu0 %v711_v15  ;;  %v596_v15 = vld [vmem:[%s1843_s17 + $0x138] sm:$0xff] }
  0x57   : > { %832 = vmatpush.bf16.xpose.msra.mxu1 %v735_v17  ;;  %v612_v17 = vld [vmem:[%s1843_s17 + $0x1b8] sm:$0xff] }
  0x58   : > { %851 = vmatpush.bf16.xpose.msra.mxu2 %v759_v18  ;;  %v624_v18 = vpack.c.bf16 %v564_v11, %v563_v9  ;;  %v648_v21 = vpack.c.bf16 %v612_v17, %v611_v16  ;;  %v637_v9 = vpack.c.bf16 %v590_v2, %v589_v63  ;;  %v1364_v16 = vld [vmem:[%s2048_s4 + $0x8] sm:$0xff] }
  0x59   : > { %870 = vmatpush.bf16.xpose.msra.mxu3 %v783_v22 }
  0x5a   : > { %v909_v22 = vsel %vm892_vm1, %v624_v18, 0  ;;  %v981_v29 = vsel %vm892_vm1, %v648_v21, 0 }
  0x5d   : > { %1330 = vmatmul.msk.bf16.vlgmr.msra.gmra.mxu0 %vm703_vm0, %v1365_v35 }
  0x5e   : > { %995 = vmatpush.bf16.xpose.msrb.mxu0 %v921_v19  ;;  %1332 = vmatmul.msk.bf16.vlgmr.msra.gmra.mxu1 %vm703_vm0, %v1365_v35  ;;  %v632_v19 = vpack.c.bf16 %v580_v13, %v579_v12  ;;  %v924_v12 = vsel %vm892_vm1, %v629_v6, 0  ;;  %v948_v13 = vsel %vm892_vm1, %v637_v9, 0 }
  0x5f   : > { %1014 = vmatpush.bf16.xpose.msrb.mxu1 %v945_v20  ;;  %1334 = vmatmul.msk.bf16.vlgmr.msra.gmra.mxu2 %vm703_vm0, %v1365_v35  ;;  %v640_v20 = vpack.c.bf16 %v596_v15, %v595_v14  ;;  %v1074_v14 = vld [vmem:[%s2050_s6 + $0x18] sm:$0xff]  ;;  %v1363_v15 = vld [vmem:[%s2048_s4] sm:$0xff] }
  0x60   : > { %1033 = vmatpush.bf16.xpose.msrb.mxu2 %v969_v23  ;;  %1336 = vmatmul.msk.bf16.vlgmr.msra.gmra.mxu3 %vm703_vm0, %v1365_v35  ;;  %v933_v23 = vsel %vm892_vm1, %v632_v19, 0 }
  0x61   : > { %1052 = vmatpush.bf16.xpose.msrb.mxu3 %v993_v27  ;;  %v957_v25 = vsel %vm892_vm1, %v640_v20, 0  ;;  %v577_v27 = vld [vmem:[%s1843_s17 + $0xa0] sm:$0xff] }
  0x62   : > { %v631_v35 = vpack.c.bf16 %v578_v28, %v577_v27 }
  0x64   : > { %v930_v41 = vsel %vm892_vm1, %v631_v35, 0 }
  0x66   : > { %996 = vmatpush.bf16.xpose.msrb.mxu0 %v918_v37  ;;  %v639_v37 = vpack.c.bf16 %v594_v31, %v593_v30 }
  0x67   : > { %1015 = vmatpush.bf16.xpose.msrb.mxu1 %v942_v38  ;;  %v1509_v38 = vmov 0  }
  0x68   : > { %1034 = vmatpush.bf16.xpose.msrb.mxu2 %v966_v40  ;;  %1409 = vset.pattern.permute.xlu1 %v1509_v38  ;;  %v906_v40 = vsel %vm892_vm1, %v623_v34, 0  ;;  %v954_v43 = vsel %vm892_vm1, %v639_v37, 0 }
  0x69   : > { %1053 = vmatpush.bf16.xpose.msrb.mxu3 %v990_v44  ;;  %1077 = vperm.xlu1 %1409, %v1071_v36   ;;  %v560_v44 = vld [vmem:[%s1843_s17 + $0x18] sm:$0xff] }
  0x6a   : > { %1408 = vset.pattern.permute.xlu0 %v1509_v38  ;;  %1410 = vset.pattern.permute.xlu2 %v1509_v38  ;;  %v622_v52 = vpack.c.bf16 %v560_v44, %v559_v42 }
  0x6d   : > { %1331 = vmatmul.msk.bf16.gmra.mxu0 %vm703_vm0, %v1366_v5 }
  0x6e   : > { %997 = vmatpush.bf16.xpose.msrb.mxu0 %v915_v53  ;;  %1333 = vmatmul.msk.bf16.gmra.mxu1 %vm703_vm0, %v1366_v5  ;;  %v630_v53 = vpack.c.bf16 %v576_v46, %v575_v45 }
  0x6f   : > { %1016 = vmatpush.bf16.xpose.msrb.mxu1 %v939_v54  ;;  %1335 = vmatmul.msk.bf16.gmra.mxu2 %vm703_vm0, %v1366_v5  ;;  %v638_v54 = vpack.c.bf16 %v592_v49, %v591_v48 }
  0x70   : > { %1035 = vmatpush.bf16.xpose.msrb.mxu2 %v963_v56  ;;  %1337 = vmatmul.msk.bf16.gmra.mxu3 %vm703_vm0, %v1366_v5  ;;  %v903_v56 = vsel %vm892_vm1, %v622_v52, 0  ;;  %v927_v0 = vsel %vm892_vm1, %v630_v53, 0 }
  0x71   : > { %1054 = vmatpush.bf16.xpose.msrb.mxu3 %v987_v59  ;;  %v951_v58 = vsel %vm892_vm1, %v638_v54, 0  ;;  %v558_v59 = vld [vmem:[%s1843_s17 + $0x8] sm:$0xff]  ;;  %s1367_s17 = sshll.u32 %s1581_s13, 5 }
  0x72   : > { %v621_v5 = vpack.c.bf16 %v558_v59, %v557_v57  ;;  %s1237_s23 = scalar_lea.hbm %s2053_s9, %s1367_s17  ;;  %s1465_s17 = scalar_lea.hbm %s2053_s9, 64 }
  0x73   : > { %s1241_s25 = sshll.u32 %s1237_s23, 4  ;;  %s1242_s25 = int_to_ptr.hbm [resolvable:$true] %s1241_s25 }
  0x74   : > { %v900_v11 = vsel %vm892_vm1, %v621_v5, 0  ;;  %s1459_s27 = sshra.s32 %s1242_s25, 4  ;;  %s1460_s27 = int_to_ptr.hbm [resolvable:$true] %s1459_s27 }
  0x75   : > { %s1461_s13 = scalar_lea.hbm %s1460_s27, 32  ;;  %p1466_p0 = scmp.lt.s32.totalorder %s1460_s27, %s2053_s9 }
  0x76   : > { %998 = vmatpush.bf16.xpose.msrb.mxu0 %v912_v7  ;;  %v1072_v7 = vld [vmem:[%s2050_s6 + $0x8] sm:$0xff]  ;;  %p1462_p11 = scmp.ne.s32.totalorder %s1460_s27, %s1461_s13  ;;  %p1467_p1 = scmp.lt.s32.totalorder %s1465_s17, %s1461_s13 }
  0x77   : > { %1017 = vmatpush.bf16.xpose.msrb.mxu1 %v936_v8  ;;  %v1073_v8 = vld [vmem:[%s2050_s6 + $0x10] sm:$0xff]  ;;  %1082 = vperm.xlu1 %1409, %v1072_v7  }
  0x78   : > { %1036 = vmatpush.bf16.xpose.msrb.mxu2 %v960_v10  ;;  %v645_v10 = vpack.c.bf16 %v606_v4, %v605_v3  ;;  %1087 = vperm.xlu0 %1408, %v1073_v8   ;;  %p1463_p12 = pnand %p1462_p11, %p1598_p5  ;;  %p1468_p2 = por %p1467_p1, %p1466_p0 }
  0x79   : > { %1055 = vmatpush.bf16.xpose.msrb.mxu3 %v984_v1 }
  0x7a   : > { %v972_v1 = vsel %vm892_vm1, %v645_v10, 0  ;;  %v1160_v10 = vld [vmem:[%s2052_s8] sm:$0xff]  ;;  %p1464_p13 = pneg %p1463_p12 }
  0x7b   : > { %1163 = vperm.xlu2 %1410, %v1160_v10  }
  0x7c   : > { %p1469_p3 = pnand %p1468_p2, %p1464_p13 }
  0x7e   : > { %999 = vmatpush.bf16.xpose.msrb.mxu0 %v909_v22 }
  0x7f   : > { %1018 = vmatpush.bf16.xpose.msrb.mxu1 %v933_v23 }
  0x80   : > { %1037 = vmatpush.bf16.xpose.msrb.mxu2 %v957_v25  ;;  %1092 = vperm.xlu0 %1408, %v1074_v14  }
  0x81   : > { %1056 = vmatpush.bf16.xpose.msrb.mxu3 %v981_v29 }
  0x86   : > { %1000 = vmatpush.bf16.xpose.msrb.mxu0 %v906_v40 }
  0x87   : > { %1019 = vmatpush.bf16.xpose.msrb.mxu1 %v930_v41 }
  0x88   : > { %1038 = vmatpush.bf16.xpose.msrb.mxu2 %v954_v43 }
  0x89   : > { %1057 = vmatpush.bf16.xpose.msrb.mxu3 %v978_v47 }
  0x8e   : > { %1001 = vmatpush.bf16.xpose.msrb.mxu0 %v903_v56 }
  0x8f   : > { %1020 = vmatpush.bf16.xpose.msrb.mxu1 %v927_v0 }
  0x90   : > { %1039 = vmatpush.bf16.xpose.msrb.mxu2 %v951_v58 }
  0x91   : > { %1058 = vmatpush.bf16.xpose.msrb.mxu3 %v975_v62 }
  0x96   : > { %1002 = vmatpush.bf16.xpose.msrb.mxu0 %v900_v11 }
  0x97   : > { %1021 = vmatpush.bf16.xpose.msrb.mxu1 %v924_v12 }
  0x98   : > { %1040 = vmatpush.bf16.xpose.msrb.mxu2 %v948_v13 }
  0x99   : > { %1059 = vmatpush.bf16.xpose.msrb.mxu3 %v972_v1 }
  0x9d   : > { %1346 = vmatmul.msk.bf16.vlgmr.msrb.gmra.mxu0 %vm892_vm1, %v1363_v15 }
  0x9e   : > { %1348 = vmatmul.msk.bf16.vlgmr.msrb.gmra.mxu1 %vm892_vm1, %v1363_v15 }
  0x9f   : > { %1350 = vmatmul.msk.bf16.vlgmr.msrb.gmra.mxu2 %vm892_vm1, %v1363_v15 }
  0xa0   : > { %1352 = vmatmul.msk.bf16.vlgmr.msrb.gmra.mxu3 %vm892_vm1, %v1363_v15 }
  0xad   : > { %1347 = vmatmul.msk.bf16.gmra.mxu0 %vm892_vm1, %v1364_v16 }
  0xae   : > { %1349 = vmatmul.msk.bf16.gmra.mxu1 %vm892_vm1, %v1364_v16 }
  0xaf   : > { %1351 = vmatmul.msk.bf16.gmra.mxu2 %vm892_vm1, %v1364_v16 }
  0xb0   : > { %1353 = vmatmul.msk.bf16.gmra.mxu3 %vm892_vm1, %v1364_v16 }
  0xda   : > { %v815_v17 = vpop.f32.mrf.mxu0 }
  0xdb   : > { %v834_v18 = vpop.f32.mrf.mxu1  ;;  %v1078_v35 = vpop.permute.xlu1 %1077 }
  0xe2   : > { %v853_v19 = vpop.f32.mrf.mxu2  ;;  %v817_v21 = vpop.f32.mrf.mxu0 }
  0xe3   : > { %v872_v20 = vpop.f32.mrf.mxu3  ;;  %v836_v22 = vpop.f32.mrf.mxu1 }
  0xe9   : > { %v1083_v42 = vpop.permute.xlu1 %1082 }
  0xea   : > { %v855_v23 = vpop.f32.mrf.mxu2  ;;  %v820_v25 = vpop.f32.mrf.mxu0 }
  0xeb   : > { %v874_v24 = vpop.f32.mrf.mxu3  ;;  %v839_v26 = vpop.f32.mrf.mxu1 }
  0xec   : > { %v1088_v45 = vpop.permute.xlu0 %1087 }
  0xf2   : > { %v858_v27 = vpop.f32.mrf.mxu2  ;;  %v822_v29 = vpop.f32.mrf.mxu0 }
  0xf3   : > { %v877_v28 = vpop.f32.mrf.mxu3  ;;  %v841_v30 = vpop.f32.mrf.mxu1 }
  0xf4   : > { %v1093_v5 = vpop.permute.xlu0 %1092 }
  0xfa   : > { %v1996_v31 = vpop.f32.mrf.mxu2 }
  0xfb   : > { %v1998_v32 = vpop.f32.mrf.mxu3 }
 0x11a   : > { %v1004_v33 = vpop.f32.mrf.mxu0 }
 0x11b   : > { %v1023_v34 = vpop.f32.mrf.mxu1  ;;  %v1005_v43 = vadd.f32 %v1004_v33, %v815_v17 }
 0x11c   : > { %v1024_v46 = vadd.f32 %v1023_v34, %v834_v18 }
 0x11d   : > { %v1095_v52 = vadd.f32 %v1078_v35, %v1005_v43 }
 0x11e   : > { %v1096_v53 = vadd.f32 %v1078_v35, %v1024_v46 }
 0x122   : > { %v1042_v36 = vpop.f32.mrf.mxu2  ;;  %v1006_v38 = vpop.f32.mrf.mxu0 }
 0x123   : > { %v1061_v37 = vpop.f32.mrf.mxu3  ;;  %v1025_v39 = vpop.f32.mrf.mxu1  ;;  %v1007_v40 = vadd.f32 %v1006_v38, %v817_v21  ;;  %v1043_v58 = vadd.f32 %v1042_v36, %v853_v19 }
 0x124   : > { %v1026_v41 = vadd.f32 %v1025_v39, %v836_v22  ;;  %v1062_v14 = vadd.f32 %v1061_v37, %v872_v20 }
 0x125   : > { %v1099_v49 = vadd.f32 %v1083_v42, %v1007_v40  ;;  %v1097_v11 = vadd.f32 %v1078_v35, %v1043_v58 }
 0x126   : > { %v1100_v51 = vadd.f32 %v1083_v42, %v1026_v41  ;;  %v1098_v33 = vadd.f32 %v1078_v35, %v1062_v14 }
 0x127   : > { %v1111_v54 = vpack.c.bf16 %v1099_v49, %v1095_v52 }
 0x128   : > { %v1112_v55 = vpack.c.bf16 %v1100_v51, %v1096_v53 }
 0x129   : > { %v1119_v62 = vunpack.c.l.bf16 %v1111_v54  ;;  %v1123_v7 = vunpack.c.h.bf16 %v1111_v54 }
 0x12a   : > { %v1044_v44 = vpop.f32.mrf.mxu2  ;;  %v1009_v48 = vpop.f32.mrf.mxu0  ;;  %v1120_v3 = vunpack.c.l.bf16 %v1112_v55  ;;  %v1124_v34 = vunpack.c.h.bf16 %v1112_v55 }
 0x12b   : > { %v1063_v47 = vpop.f32.mrf.mxu3  ;;  %v1028_v50 = vpop.f32.mrf.mxu1  ;;  %v1045_v56 = vadd.f32 %v1044_v44, %v855_v23  ;;  %v1010_v0 = vadd.f32 %v1009_v48, %v820_v25  ;;  %1413 = vtanh.f32 %v1119_v62 }
 0x12c   : > { %v1029_v59 = vadd.f32 %v1028_v50, %v839_v26  ;;  %v1064_v12 = vadd.f32 %v1063_v47, %v874_v24  ;;  %1415 = vtanh.f32 %v1120_v3 }
 0x12d   : > { %v1101_v4 = vadd.f32 %v1083_v42, %v1045_v56  ;;  %v1103_v8 = vadd.f32 %v1088_v45, %v1010_v0  ;;  %1417 = vtanh.f32 %v1123_v7 }
 0x12e   : > { %v1104_v13 = vadd.f32 %v1088_v45, %v1029_v59  ;;  %v1102_v25 = vadd.f32 %v1083_v42, %v1064_v12 }
 0x12f   : > { %v1113_v16 = vpack.c.bf16 %v1101_v4, %v1097_v11 }
 0x130   : > { %v1114_v42 = vpack.c.bf16 %v1102_v25, %v1098_v33 }
 0x131   : > { %v1121_v36 = vunpack.c.l.bf16 %v1113_v16  ;;  %v1414_v38 = vpop.eup %1413 }
 0x132   : > { %v1047_v57 = vpop.f32.mrf.mxu2  ;;  %v1011_v61 = vpop.f32.mrf.mxu0  ;;  %v1122_v50 = vunpack.c.l.bf16 %v1114_v42  ;;  %v1126_v51 = vunpack.c.h.bf16 %v1114_v42 }
 0x133   : > { %v1066_v60 = vpop.f32.mrf.mxu3  ;;  %v1012_v63 = vadd.f32 %v1011_v61, %v822_v29  ;;  %v1030_v2 = vpop.f32.mrf.mxu1  ;;  %v1048_v17 = vadd.f32 %v1047_v57, %v858_v27  ;;  %v1159_v61 = vld [vmem:[%s2051_s7] sm:$0xf] }
 0x134   : > { %v1031_v6 = vadd.f32 %v1030_v2, %v841_v30  ;;  %v1067_v19 = vadd.f32 %v1066_v60, %v877_v28  ;;  %v1125_v28 = vunpack.c.h.bf16 %v1113_v16  ;;  %v1416_v41 = vpop.eup %1415 }
 0x135   : > { %v1107_v9 = vadd.f32 %v1093_v5, %v1012_v63  ;;  %v1105_v37 = vadd.f32 %v1088_v45, %v1048_v17 }
 0x136   : > { %v1108_v1 = vadd.f32 %v1093_v5, %v1031_v6  ;;  %v1106_v39 = vadd.f32 %v1088_v45, %v1067_v19 }
 0x137   : > { %v1115_v15 = vpack.c.bf16 %v1107_v9, %v1103_v8  ;;  %v1164_v8 = vpop.permute.xlu2 %1163 }
 0x138   : > { %v1116_v18 = vpack.c.bf16 %v1108_v1, %v1104_v13 }
 0x139   : > { %v1127_v21 = vunpack.c.l.bf16 %v1115_v15  ;;  %v1131_v22 = vunpack.c.h.bf16 %v1115_v15 }
 0x13a   : > { %v1049_v23 = vpop.f32.mrf.mxu2  ;;  %v1128_v26 = vunpack.c.l.bf16 %v1116_v18  ;;  %v1132_v29 = vunpack.c.h.bf16 %v1116_v18 }
 0x13b   : > { %v1050_v24 = vadd.f32 %v1049_v23, %v1996_v31  ;;  %v1068_v30 = vpop.f32.mrf.mxu3  ;;  %1419 = vtanh.f32 %v1127_v21  ;;  %v1418_v31 = vpop.eup %1417 }
 0x13c   : > { %v1069_v20 = vadd.f32 %v1068_v30, %v1998_v32  ;;  %1421 = vtanh.f32 %v1131_v22  ;;  %v1151_v57 = vpack.c.bf16 %v1418_v31, %v1414_v38 }
 0x13d   : > { %v1109_v27 = vadd.f32 %v1093_v5, %v1050_v24  ;;  %1423 = vtanh.f32 %v1128_v26 }
 0x13e   : > { %v1110_v40 = vadd.f32 %v1093_v5, %v1069_v20  ;;  %1425 = vtanh.f32 %v1132_v29 }
 0x13f   : > { %v1117_v43 = vpack.c.bf16 %v1109_v27, %v1105_v37  ;;  %1427 = vtanh.f32 %v1124_v34 }
 0x140   : > { %v1118_v35 = vpack.c.bf16 %v1110_v40, %v1106_v39  ;;  %1429 = vtanh.f32 %v1121_v36 }
 0x141   : > { %v1129_v44 = vunpack.c.l.bf16 %v1117_v43  ;;  %v1133_v46 = vunpack.c.h.bf16 %v1117_v43  ;;  %v1420_v32 = vpop.eup %1419  ;;  %1431 = vtanh.f32 %v1125_v28 }
 0x142   : > { %v1130_v47 = vunpack.c.l.bf16 %v1118_v35  ;;  %v1134_v48 = vunpack.c.h.bf16 %v1118_v35  ;;  %v1422_v49 = vpop.eup %1421 }
 0x143   : > { %1433 = vtanh.f32 %v1129_v44  ;;  %v1424_v45 = vpop.eup %1423  ;;  %v1155_v52 = vpack.c.bf16 %v1422_v49, %v1420_v32 }
 0x144   : > { %1435 = vtanh.f32 %v1133_v46  ;;  %v1426_v53 = vpop.eup %1425 }
 0x145   : > { %1437 = vtanh.f32 %v1130_v47  ;;  %v1428_v54 = vpop.eup %1427  ;;  %1175 = vmatpush.bf16.msra.mxu0 %v1155_v52  ;;  %v1156_v55 = vpack.c.bf16 %v1426_v53, %v1424_v45 }
 0x146   : > { %1439 = vtanh.f32 %v1134_v48  ;;  %v1430_v56 = vpop.eup %1429  ;;  %v1152_v60 = vpack.c.bf16 %v1428_v54, %v1416_v41 }
 0x147   : > { %1441 = vtanh.f32 %v1122_v50  ;;  %v1432_v0 = vpop.eup %1431  ;;  %1188 = vmatpush.bf16.msra.mxu1 %v1156_v55 }
 0x148   : > { %1443 = vtanh.f32 %v1126_v51  ;;  %v1153_v6 = vpack.c.bf16 %v1432_v0, %v1430_v56 }
 0x149   : > { %v1434_v58 = vpop.eup %1433  ;;  %1176 = vmatpush.bf16.msra.mxu0 %v1151_v57 }
 0x14a   : > { %v1436_v59 = vpop.eup %1435 }
 0x14b   : > { %v1438_v62 = vpop.eup %1437  ;;  %v1157_v63 = vpack.c.bf16 %v1436_v59, %v1434_v58  ;;  %1189 = vmatpush.bf16.msra.mxu1 %v1152_v60 }
 0x14c   : > { %v1440_v2 = vpop.eup %1439  ;;  %1354 = vmatmul.msk.bf16.vlgmr.msra.gmra.mxu0 %vm892_vm1, %v1159_v61 }
 0x14d   : > { %v1442_v3 = vpop.eup %1441  ;;  %1201 = vmatpush.bf16.msra.mxu2 %v1157_v63  ;;  %v1158_v4 = vpack.c.bf16 %v1440_v2, %v1438_v62 }
 0x14e   : > { %v1444_v5 = vpop.eup %1443  ;;  %1355 = vmatmul.msk.bf16.vlgmr.msra.gmra.mxu1 %vm892_vm1, %v1159_v61 }
 0x14f   : > { %1214 = vmatpush.bf16.msra.mxu3 %v1158_v4  ;;  %v1154_v7 = vpack.c.bf16 %v1444_v5, %v1442_v3 }
 0x151   : > { %1202 = vmatpush.bf16.msra.mxu2 %v1153_v6 }
 0x153   : > { %1215 = vmatpush.bf16.msra.mxu3 %v1154_v7 }
 0x154   : > { %1356 = vmatmul.msk.bf16.vlgmr.msra.gmra.mxu2 %vm892_vm1, %v1159_v61 }
 0x156   : > { %1357 = vmatmul.msk.bf16.vlgmr.msra.gmra.mxu3 %vm892_vm1, %v1159_v61 }
 0x1c9   : > { %v1178_v9 = vpop.f32.mrf.mxu0 }
 0x1ca   : > { %v1179_v10 = vadd.f32 %v1178_v9, %v1164_v8 }
 0x1cb   : > { %v1191_v11 = vpop.f32.mrf.mxu1 }
 0x1cc   : > { %v1192_v12 = vadd.f32 %v1191_v11, %v1164_v8  ;;  %1221 = vst [vmem:[%s342_s16] sm:$0xff] %v1179_v10 }
 0x1ce   : > { %1222 = vst [vmem:[%s342_s16 + $0x8] sm:$0xff] %v1192_v12 }
 0x1d1   : > { %v1180_v13 = vpop.f32.mrf.mxu0 }
 0x1d3   : > { %v1193_v1 = vpop.f32.mrf.mxu1 }
 0x1d7   : > { %v1204_v14 = vpop.f32.mrf.mxu2 }
 0x1d8   : > { %v1205_v15 = vadd.f32 %v1204_v14, %v1164_v8 }
 0x1d9   : > { %v1217_v16 = vpop.f32.mrf.mxu3 }
 0x1da   : > { %v1218_v17 = vadd.f32 %v1217_v16, %v1164_v8  ;;  %1223 = vst [vmem:[%s342_s16 + $0x10] sm:$0xff] %v1205_v15 }
 0x1dc   : > { %1224 = vst [vmem:[%s342_s16 + $0x18] sm:$0xff] %v1218_v17 }
 0x1dd   : > { %1472 = shalt.err (!%p1469_p3)
}
 0x1de   : > { %1368 = dma.vmem_to_hbm [thread:$0]  (%p1598_p5), %s1240_s24, 512, %s1242_s25, %s1226_s26  }
 0x1df   : > { %v1206_v18 = vpop.f32.mrf.mxu2 }
 0x1e1   : > { %v1219_v19 = vpop.f32.mrf.mxu3 }
 0x1e2 PF: > { %p1374_p4 = scmp.ge.s32.totalorder %s1507_s12, 2  ;;  %s1253_s29 = sand.u32 1, %s1495_s30  }
 0x1e3   : > { %s1254_s16 = scalar_lea.sflag [#allocation3], %s1253_s29 }
 0x1e4   : > { %p1371_p7 = pnand %p1374_p4, %p1602_p6 }
 0x1e6   : > { %p1372_p8 = pneg %p1371_p7 }
 0x1e8   : > { %1490 = dma.done.wait (%p1372_p8), %s1254_s16, 512  }
 0x1e9   : > { %1492 = vsyncadd (%p1372_p8), %s1254_s16, 4294966784  ;;  %p19_p5 = scmp.ge.s32.totalorder %s1585_s15, 4   ;;  %s2056_s30 = smov %s1499_s10 }
 0x1ea   : > { %s2057_s10 = smov %s1503_s11  ;;  %s2058_s11 = smov %s1596_s18 }
 0x1eb   : > { %s2059_s12 = smov %s1585_s15  ;;  %21 = sbr.rel (!%p19_p5) target bundleno = 3 (0x3), region = 94 }
 0x1f0   :  { %1260 = vsyncpa [#allocation3], 1 }
 0x1f1   :  { %1262 = vsyncpa [#allocation3 + $0x1], 1 }

</bundles_post_ra>
